<compile_context>
chip_gen: v5e
topology: v5e:2x2
jax: 0.10.0
libtpu: 0.0.40
codegen_flags: <defaults>
</compile_context>

<pallas_src>
import jax
import jax.numpy as jnp
from jax.experimental import pallas as pl
from jax.experimental.pallas import tpu as pltpu


def _dot_attention_kernel(enc_ref, dec_ref, *rest):
    """rest = (wp_ref, ctx_ref, alpha_ref) when projecting, else (ctx_ref, alpha_ref)."""
    if len(rest) == 3:
        wp_ref, ctx_ref, alpha_ref = rest
    else:
        wp_ref = None
        ctx_ref, alpha_ref = rest

    S, Bb, E = enc_ref.shape

    # Batch-major relayout once, in VMEM (minor dim preserved -> cheap, no HBM traffic).
    enc_b = pltpu.einshape("sbe->bse", enc_ref[...])               # (Bb, S, E)
    dec = dec_ref[...].astype(jnp.float32)                         # (Bb, D)

    if wp_ref is not None:
        d = wp_ref.shape[1]
        # Single fat MXU matmul with M = Bb * S rows, f32 accumulation.
        x = jnp.dot(enc_b.reshape(Bb * S, E), wp_ref[...],
                    preferred_element_type=jnp.float32).reshape(Bb, S, d)
    else:
        x = enc_b.astype(jnp.float32)                              # (Bb, S, E); E == D

    # scores[b, s] = <x[b, s, :], dec[b, :]> : VPU multiply + lane reduction over D.
    scores = jnp.sum(x * dec[:, None, :], axis=-1)                 # (Bb, S), S lane-dense

    # Softmax over S — lane reductions on full rows.
    m = jnp.max(scores, axis=-1, keepdims=True)                    # (Bb, 1)
    p = jnp.exp(scores - m)                                        # (Bb, S)
    alpha = p * pl.reciprocal(jnp.sum(p, axis=-1, keepdims=True))  # exact reciprocal

    # Context on the MXU: batched (Bb, 1, S) @ (Bb, S, D) -> (Bb, D).
    ctx = jnp.einsum("bqs,bsd->bqd", alpha[:, None, :], x,
                     preferred_element_type=jnp.float32)[:, 0, :]

    ctx_ref[...] = ctx.astype(ctx_ref.dtype)
    alpha_ref[...] = alpha.astype(alpha_ref.dtype)


def _pick_block_b(B, S, E, target_rows=256, block_bytes_budget=2 << 20):
    """Pick the batch block Bb: Bb*S >= ~256 MXU rows, enc block well inside VMEM
    (safe for v7x's 64 MiB), and Bb a multiple of 8 (or == B) since it tiles the
    second-minor dim of (S, B, E)."""
    bb = max(1, -(-target_rows // S))                       # ceil(target_rows / S)
    max_by_vmem = max(1, block_bytes_budget // max(1, S * E * 4))
    bb = max(1, min(bb, max_by_vmem, B))
    if bb < B:
        bb = min(B, max(8, (bb // 8) * 8))
    return bb


def dot_attention(dec_state, enc_states, w_proj=None, *, block_b=None, matmul_dtype=None):
    """DotAttention forward.

    dec_state:  (B, D), enc_states: (S, B, E)
    w_proj:     (E, D) stored (in, out)  (== W_torch.T of nn.Linear(E, D, bias=False)),
                or None when E == D.
    matmul_dtype: optionally cast MXU inputs (enc_states / w_proj) to e.g. jnp.bfloat16
                on v6e / v7x; accumulation stays f32.
    Returns (ctx (B, D), alpha (S, B)).
    """
    S, B, E = enc_states.shape
    D = dec_state.shape[1]
    if w_proj is None:
        assert E == D, "DotAttention without projection requires enc_dim == dec_dim"
    else:
        assert w_proj.shape == (E, D)

    Bb = block_b if block_b is not None else _pick_block_b(B, S, E)
    grid = (pl.cdiv(B, Bb),)

    enc_in = enc_states if matmul_dtype is None else enc_states.astype(matmul_dtype)

    in_specs = [
        # enc_states indexed in its native (S, B, E) layout, batch-blocked.
        pl.BlockSpec((S, Bb, E), lambda b: (0, b, 0)),
        pl.BlockSpec((Bb, D), lambda b: (b, 0)),               # dec_state (B, D)
    ]
    inputs = [enc_in, dec_state]
    if w_proj is not None:
        wp_in = w_proj if matmul_dtype is None else w_proj.astype(matmul_dtype)
        in_specs.append(pl.BlockSpec((E, D), lambda b: (0, 0)))
        inputs.append(wp_in)

    ctx_bd, alpha_bs = pl.pallas_call(
        _dot_attention_kernel,
        out_shape=(
            jax.ShapeDtypeStruct((B, D), jnp.float32),          # ctx   (lane dim D)
            jax.ShapeDtypeStruct((B, S), jnp.float32),          # alpha (lane dim S)
        ),
        grid_spec=pltpu.PrefetchScalarGridSpec(
            num_scalar_prefetch=0,
            grid=grid,
            in_specs=in_specs,
            out_specs=[
                pl.BlockSpec((Bb, D), lambda b: (b, 0)),
                pl.BlockSpec((Bb, S), lambda b: (b, 0)),
            ],
        ),
        compiler_params=pltpu.CompilerParams(
            dimension_semantics=("parallel",)),
    )(*inputs)

    ctx = ctx_bd                                           # (B, D)
    alpha = jnp.transpose(alpha_bs, (1, 0))                # tiny (B, S) -> (S, B) reorder
    return ctx, alpha


def reference(dec_state, enc_states, w_proj=None):
    """Pure-JAX mirror of the PyTorch DotAttention.forward."""
    if w_proj is not None:
        enc_states = enc_states @ w_proj                             # (S, B, D)
    scores = jnp.sum(enc_states * dec_state[None, :, :], axis=2)     # (S, B)
    alpha = jax.nn.softmax(scores, axis=0)                           # (S, B)
    ctx = jnp.sum(alpha[..., None] * enc_states, axis=0)             # (B, D)
    return ctx, alpha


if __name__ == "__main__":
    S, B = 8, 2
    ENC_DIM, DEC_DIM = 32, 16          # enc_dim != dec_dim -> exercises the projection

    key = jax.random.PRNGKey(0)
    k_enc, k_dec, k_w, k_enc2 = jax.random.split(key, 4)

    enc_states = jax.random.normal(k_enc, (S, B, ENC_DIM), jnp.float32)
    dec_state = jax.random.normal(k_dec, (B, DEC_DIM), jnp.float32)
    # nn.Linear(enc_dim, dec_dim, bias=False): y = x @ W.T; we store W.T as (E, D).
    w_proj = 0.3 * jax.random.normal(k_w, (ENC_DIM, DEC_DIM), jnp.float32)

    # Projection path (enc_dim != dec_dim).
    ctx, alpha = dot_attention(dec_state, enc_states, w_proj)
    jax.block_until_ready((ctx, alpha))
    ctx_ref, alpha_ref = reference(dec_state, enc_states, w_proj)
    assert ctx.shape == (B, DEC_DIM) and alpha.shape == (S, B)
    assert jnp.allclose(ctx, ctx_ref, atol=2e-3, rtol=2e-3)
    assert jnp.allclose(alpha, alpha_ref, atol=2e-3, rtol=2e-3)

    # No-projection path (enc_dim == dec_dim).
    enc_states_eq = jax.random.normal(k_enc2, (S, B, DEC_DIM), jnp.float32)
    ctx2, alpha2 = dot_attention(dec_state, enc_states_eq, None)
    jax.block_until_ready((ctx2, alpha2))
    ctx2_ref, alpha2_ref = reference(dec_state, enc_states_eq, None)
    assert jnp.allclose(ctx2, ctx2_ref, atol=2e-3, rtol=2e-3)
    assert jnp.allclose(alpha2, alpha2_ref, atol=2e-3, rtol=2e-3)

    print("KERNEL_OK")
</pallas_src>

<mosaic_0001>
module attributes {stable_mosaic.version = 11 : i64} {
  func.func @_dot_attention_kernel(%arg0: i32, %arg1: memref<8x2x32xf32, #tpu.memory_space<vmem>>, %arg2: memref<2x16xf32, #tpu.memory_space<vmem>>, %arg3: memref<32x16xf32, #tpu.memory_space<vmem>>, %arg4: memref<2x16xf32, #tpu.memory_space<vmem>>, %arg5: memref<2x8xf32, #tpu.memory_space<vmem>>) attributes {dimension_semantics = [#tpu.dimension_semantics<parallel>], iteration_bounds = array<i64: 1>, scalar_prefetch = 0 : i64, scratch_operands = 0 : i64, tpu.core_type = #tpu.core_type<tc>, window_params = [{transform_indices = @transform_0, window_bounds = array<i64: 8, 2, 32>}, {transform_indices = @transform_1, window_bounds = array<i64: 2, 16>}, {pipeline_mode = #tpu.pipeline_mode<synchronous>, transform_indices = @transform_2, window_bounds = array<i64: 32, 16>}, {transform_indices = @transform_3, window_bounds = array<i64: 2, 16>}, {transform_indices = @transform_4, window_bounds = array<i64: 2, 8>}]} {
    %c0 = arith.constant 0 : index
    %c0_0 = arith.constant 0 : index
    %c0_1 = arith.constant 0 : index
    %0 = vector.load %arg1[%c0, %c0_0, %c0_1] : memref<8x2x32xf32, #tpu.memory_space<vmem>>, vector<8x2x32xf32>
    %1 = tpu.transpose %0, [1, 0, 2] : vector<8x2x32xf32> -> vector<2x8x32xf32>
    %c0_2 = arith.constant 0 : index
    %c0_3 = arith.constant 0 : index
    %2 = vector.load %arg2[%c0_2, %c0_3] : memref<2x16xf32, #tpu.memory_space<vmem>>, vector<2x16xf32>
    %3 = vector.shape_cast %1 : vector<2x8x32xf32> to vector<16x32xf32>
    %c0_4 = arith.constant 0 : index
    %c0_5 = arith.constant 0 : index
    %4 = vector.load %arg3[%c0_4, %c0_5] : memref<32x16xf32, #tpu.memory_space<vmem>>, vector<32x16xf32>
    %cst = arith.constant dense<0.000000e+00> : vector<16x16xf32>
    %5 = tpu.matmul %3, %4, %cst {dimension_numbers = #tpu.dot_dimension_numbers<[1], [0], [0], [1], [0, 0, 1, 1], [], []>} : vector<16x32xf32>, vector<32x16xf32>, vector<16x16xf32> -> vector<16x16xf32>
    %6 = vector.shape_cast %5 : vector<16x16xf32> to vector<2x8x16xf32>
    %7 = vector.shape_cast %2 : vector<2x16xf32> to vector<2x1x16xf32>
    %8 = vector.broadcast %7 : vector<2x1x16xf32> to vector<2x8x16xf32>
    %9 = arith.mulf %6, %8 : vector<2x8x16xf32>
    %cst_6 = arith.constant dense<0.000000e+00> : vector<2x8xf32>
    %10 = vector.multi_reduction <add>, %9, %cst_6 [2] : vector<2x8x16xf32> to vector<2x8xf32>
    %cst_7 = arith.constant dense<0xFF800000> : vector<2xf32>
    %11 = vector.multi_reduction <maximumf>, %10, %cst_7 [1] : vector<2x8xf32> to vector<2xf32>
    %12 = vector.shape_cast %11 : vector<2xf32> to vector<2x1xf32>
    %13 = vector.broadcast %12 : vector<2x1xf32> to vector<2x8xf32>
    %14 = arith.subf %10, %13 : vector<2x8xf32>
    %15 = math.exp %14 : vector<2x8xf32>
    %cst_8 = arith.constant dense<0.000000e+00> : vector<2xf32>
    %16 = vector.multi_reduction <add>, %15, %cst_8 [1] : vector<2x8xf32> to vector<2xf32>
    %17 = vector.shape_cast %16 : vector<2xf32> to vector<2x1xf32>
    %18 = tpu.reciprocal %17 : vector<2x1xf32> -> vector<2x1xf32>
    %19 = vector.broadcast %18 : vector<2x1xf32> to vector<2x8xf32>
    %20 = arith.mulf %15, %19 : vector<2x8xf32>
    %21 = vector.shape_cast %20 : vector<2x8xf32> to vector<2x1x8xf32>
    "tpu.trace_start"() <{level = 10 : i32, message = "bqs,bsd->bqd"}> : () -> ()
    %cst_9 = arith.constant dense<0.000000e+00> : vector<2x1x16xf32>
    %22 = tpu.matmul %21, %6, %cst_9 {dimension_numbers = #tpu.dot_dimension_numbers<[2], [1], [1], [2], [0, 0, 0, 1, 1, 2], [0], [0]>} : vector<2x1x8xf32>, vector<2x8x16xf32>, vector<2x1x16xf32> -> vector<2x1x16xf32>
    "tpu.trace_stop"() : () -> ()
    %23 = vector.shape_cast %22 : vector<2x1x16xf32> to vector<2x16xf32>
    %c0_10 = arith.constant 0 : index
    %c0_11 = arith.constant 0 : index
    %24 = vector.load %arg4[%c0_10, %c0_11] : memref<2x16xf32, #tpu.memory_space<vmem>>, vector<2x16xf32>
    tpu.vector_store %arg4[%c0_10, %c0_11], %23 {strides = array<i32>} : memref<2x16xf32, #tpu.memory_space<vmem>>, vector<2x16xf32>,
    %c0_12 = arith.constant 0 : index
    %c0_13 = arith.constant 0 : index
    %25 = vector.load %arg5[%c0_12, %c0_13] : memref<2x8xf32, #tpu.memory_space<vmem>>, vector<2x8xf32>
    tpu.vector_store %arg5[%c0_12, %c0_13], %20 {strides = array<i32>} : memref<2x8xf32, #tpu.memory_space<vmem>>, vector<2x8xf32>,
    return
  }
  func.func @transform_0(%arg0: i32) -> (i32, i32, i32) {
    %c0_i32 = arith.constant 0 : i32
    %c0_i32_0 = arith.constant 0 : i32
    %c0_i32_1 = arith.constant 0 : i32
    return %c0_i32, %arg0, %c0_i32_0 : i32, i32, i32
  }
  func.func @transform_1(%arg0: i32) -> (i32, i32) {
    %c0_i32 = arith.constant 0 : i32
    %c0_i32_0 = arith.constant 0 : i32
    return %arg0, %c0_i32 : i32, i32
  }
  func.func @transform_2(%arg0: i32) -> (i32, i32) {
    %c0_i32 = arith.constant 0 : i32
    %c0_i32_0 = arith.constant 0 : i32
    %c0_i32_1 = arith.constant 0 : i32
    return %c0_i32, %c0_i32_0 : i32, i32
  }
  func.func @transform_3(%arg0: i32) -> (i32, i32) {
    %c0_i32 = arith.constant 0 : i32
    %c0_i32_0 = arith.constant 0 : i32
    return %arg0, %c0_i32 : i32, i32
  }
  func.func @transform_4(%arg0: i32) -> (i32, i32) {
    %c0_i32 = arith.constant 0 : i32
    %c0_i32_0 = arith.constant 0 : i32
    return %arg0, %c0_i32 : i32, i32
  }
}

</mosaic_0001>

<bundles_post_ra>
// kernel: tpu_custom_call.1
= control target key start
LH: loop header
LB: loop body
LE: loop exit
PB: predicated region body
PF: predicated region fallthrough
CT: control target
= control target key end

     0   :  { %10 = vsyncpa [#allocation3], 0  ;;  %vm27_vm0 = vcmask 1047556   ;;  %v348_v5 = vmov 1983009808   ;;  %s438_s0 = inlined_call_operand.vmem [shape: f32[8,2,32], index: 0, kind: input, shape index: {}]   ;;  %s439_s1 = inlined_call_operand.vmem [shape: f32[2,16], index: 1, kind: input, shape index: {}]   ;;  %s440_s2 = inlined_call_operand.vmem [shape: f32[32,16], index: 2, kind: input, shape index: {}]   ;;  %s441_s3 = inlined_call_operand.hbm [shape: f32[2,16], index: 3, kind: output, shape index: {0}]   ;;  %s442_s4 = inlined_call_operand.hbm [shape: f32[2,8], index: 4, kind: output, shape index: {1}]  }
   0x1   :  { %v71_v0 = vld [vmem:[%s440_s2 + $0x18] sm:$0xff]  ;;  %v70_v1 = vld [vmem:[%s440_s2 + $0x10] sm:$0xff]  ;;  %v69_v2 = vld [vmem:[%s440_s2 + $0x8] sm:$0xff]  ;;  %v30_v6 = vunpack.c.l.s4 %v348_v5 }
   0x2   :  { %91 = vmatpush.msra.mxu0 %v71_v0  ;;  %278 = vmatpush.msra.mxu3 %v71_v0  ;;  %v18_v3 = vld [vmem:[%s438_s0] sm:$0x3]  ;;  %v19_v4 = vld [vmem:[%s438_s0 + $0x2] sm:$0x3]  ;;  %v20_v7 = vld [vmem:[%s438_s0 + $0x4] sm:$0x3] }
   0x3   :  { %v21_v8 = vld [vmem:[%s438_s0 + $0x6] sm:$0x3]  ;;  %v22_v9 = vld [vmem:[%s438_s0 + $0x8] sm:$0x3]  ;;  %v23_v10 = vld [vmem:[%s438_s0 + $0xa] sm:$0x3]  ;;  %v31_v13 = vunpack.c.0.s8 %v30_v6 }
   0x4   :  { %92 = vmatpush.msra.mxu0 %v70_v1  ;;  %279 = vmatpush.msra.mxu3 %v70_v1  ;;  %v24_v11 = vld [vmem:[%s438_s0 + $0xc] sm:$0x3]  ;;  %v25_v12 = vld [vmem:[%s438_s0 + $0xe] sm:$0x3]  ;;  %v68_v14 = vld [vmem:[%s440_s2] sm:$0xff]  ;;  %v26_v15 = vrot.slane %v20_v7, 4 }
   0x5   :  { %v33_v16 = vrot.slane %v21_v8, 4  ;;  %v39_v17 = vrot.slane %v24_v11, 4  ;;  %v45_v18 = vrot.slane %v25_v12, 4 }
   0x6   :  { %93 = vmatpush.msra.mxu0 %v69_v2  ;;  %280 = vmatpush.msra.mxu3 %v69_v2 }
   0x7   :  { %11 = vsyncpa [#allocation5], 0  ;;  %v28_v19 = vsel %vm27_vm0, %v26_v15, %v18_v3  ;;  %v34_v20 = vsel %vm27_vm0, %v33_v16, %v19_v4  ;;  %v40_v21 = vsel %vm27_vm0, %v39_v17, %v22_v9  ;;  %v46_v22 = vsel %vm27_vm0, %v45_v18, %v23_v10  ;;  %v67_v40 = vld [vmem:[%s439_s1] sm:$0x3]  ;;  %s351_s1 = smov [#allocation4]   ;;  %s260_s16 = sshll.u32 %s442_s4, 4  ;;  %s261_s16 = int_to_ptr.hbm [resolvable:$true] %s260_s16 }
   0x8   :  { %94 = vmatpush.msra.mxu0 %v68_v14  ;;  %v32_v23 = vperm.slane %v28_v19, %v31_v13  ;;  %v38_v24 = vperm.slane %v34_v20, %v31_v13  ;;  %v44_v25 = vperm.slane %v40_v21, %v31_v13  ;;  %v50_v26 = vperm.slane %v46_v22, %v31_v13  ;;  %s258_s13 = sshll.u32 %s351_s1, 4  ;;  %s352_s17 = smov [#allocation2]   ;;  %s259_s13 = int_to_ptr.vmem [resolvable:$true] %s258_s13 }
   0x9   :  { %v349_v27 = vmov 1934713408   ;;  %281 = vmatpush.msra.mxu3 %v68_v14  ;;  %vm72_vm1 = vcmask 261120   ;;  %v104_v41 = vperm.slane %v67_v40, 0  ;;  %v103_v42 = vrot.slane %v67_v40, 1  ;;  %s247_s18 = sshll.u32 %s352_s17, 4  ;;  %s248_s18 = int_to_ptr.vmem [resolvable:$true] %s247_s18 }
   0xa   :  { %v54_v28 = vunpack.c.l.s4 %v349_v27  ;;  %v51_v29 = vrot.slane %v38_v24, 4  ;;  %v57_v30 = vrot.slane %v50_v26, 4  ;;  %vm110_vm2 = vcmask 130048   ;;  %s249_s21 = sshll.u32 %s441_s3, 4  ;;  %s250_s21 = int_to_ptr.hbm [resolvable:$true] %s249_s21 }
   0xb   :  { %v105_v46 = vperm.slane %v103_v42, 0  ;;  %v119_v51 = vlaneseq  ;;  %vm123_vm3 = vcmask 1041409   ;;  %vm126_vm4 = vcmask 58368  }
   0xc   :  { %v55_v31 = vunpack.c.0.s8 %v54_v28  ;;  %v52_v32 = vsel %vm27_vm0, %v51_v29, %v32_v23  ;;  %v58_v33 = vsel %vm27_vm0, %v57_v30, %v44_v25  ;;  %v350_v58 = vmov 0  }
   0xd   :  { %v120_v52 = vand.u32 127, %v119_v51  ;;  %288 = vset.pattern.permute.xlu2 %v350_v58  ;;  %287 = vset.pattern.permute.xlu1 %v350_v58  ;;  %vm182_vm9 = vcmask 64512   ;;  %vm237_vm10 = vcmask 123904  }
   0xe   :  { %v56_v34 = vperm.slane %v52_v32, %v55_v31  ;;  %v62_v35 = vperm.slane %v58_v33, %v55_v31  ;;  %289 = vset.pattern.permute.xlu0 %v350_v58 }
  0x10   :  { %v63_v36 = vrot.slane %v62_v35, 4  ;;  %v65_v37 = vrot.slane %v56_v34, 4 }
  0x12   :  { %v64_v38 = vsel %vm27_vm0, %v63_v36, %v56_v34  ;;  %v66_v39 = vsel %vm27_vm0, %v62_v35, %v65_v37 }
  0x13   :  { %274 = vmatmul.msk.f32.vlgmr.msra.gmra.mxu0 %vm72_vm1, %v64_v38  ;;  %275 = vmatmul.msk.f32.vlgmr.msra.gmra.mxu3 %vm72_vm1, %v66_v39 }
  0x90   :  { %v96_v43 = vpop.f32.mrf.mxu0 }
  0x91   :  { %v108_v44 = vmul.f32 %v104_v41, %v96_v43  ;;  %200 = vmatpush.msra.mxu1 %v96_v43 }
  0x93   :  { %v111_v45 = vsel %vm110_vm2, %v108_v44, 0.0 }
  0x94   :  { %112 = vadd.xlane.f32.xlu0 %v111_v45 }
  0x96   :  { %v99_v47 = vpop.f32.mrf.mxu3 }
  0x97   :  { %v109_v48 = vmul.f32 %v105_v46, %v99_v47  ;;  %227 = vmatpush.msra.mxu2 %v99_v47 }
  0x99   :  { %v114_v49 = vsel %vm110_vm2, %v109_v48, 0.0 }
  0x9c   :  { %115 = vadd.xlane.f32.xlu0 %v114_v49 }
 0x107   :  { %v113_v50 = vpop.xlane.xlu0 %112 }
 0x108   :  { %v121_v54 = vperm.slane %v113_v50, %v120_v52 }
 0x10f   :  { %v116_v53 = vpop.xlane.xlu0 %115 }
 0x110   :  { %v122_v55 = vperm.slane %v116_v53, %v120_v52 }
 0x112   :  { %v124_v56 = vsel %vm123_vm3, %v122_v55, %v121_v54 }
 0x113   :  { %v127_v57 = vsel %vm126_vm4, %v124_v56, -inf }
 0x114   :  { %128 = vmax.xlane.f32.xlu1 %v127_v57 }
 0x187   :  { %v129_v59 = vpop.xlane.xlu1 %128 }
 0x188   :  { %v131_v60 = vperm.slane %v129_v59, 0  ;;  %v132_v61 = vperm.slane %v129_v59, 1 }
 0x18a   :  { %v135_v62 = vsub.f32 %v113_v50, %v131_v60  ;;  %v136_v63 = vsub.f32 %v116_v53, %v132_v61 }
 0x18c   :  { %v137_v0 = vmul.f32 1.442695, %v135_v62  ;;  %v139_v1 = vmul.f32 1.442695, %v136_v63 }
 0x18e   :  { %290 = vpow2.f32 %v137_v0 }
 0x18f   :  { %292 = vpow2.f32 %v139_v1 }
 0x194   :  { %v291_v2 = vpop.eup %290 }
 0x195   :  { %v293_v3 = vpop.eup %292  ;;  %144 = vperm.xlu1 %287, %v291_v2  }
 0x196   :  { %147 = vperm.xlu2 %288, %v293_v3  }
 0x1f0   :  { %v148_v4 = vpop.permute.xlu2 %147 }
 0x1f1   :  { %v150_v6 = vperm.slane %v148_v4, %v120_v52 }
 0x207   :  { %v145_v5 = vpop.permute.xlu1 %144 }
 0x208   :  { %v149_v7 = vperm.slane %v145_v5, %v120_v52 }
 0x20a   :  { %v151_v8 = vsel %vm123_vm3, %v150_v6, %v149_v7 }
 0x20b   :  { %v153_v9 = vsel %vm126_vm4, %v151_v8, 0.0 }
 0x20c   :  { %154 = vadd.xlane.f32.xlu2 %v153_v9 }
 0x27f   :  { %v155_v10 = vpop.xlane.xlu2 %154 }
 0x280   :  { %294 = vrcp.f32 %v155_v10  ;;  %v167_v14 = vand.u32 2147483648, %v155_v10  ;;  %v165_v16 = vand.u32 2147483647, %v155_v10  ;;  %vm161_vm6 = vweird.f32 %v155_v10 }
 0x282   :  { %v168_v18 = vor.u32 1.1754944e-38, %v167_v14  ;;  %vm166_vm8 = vcmp.eq.f32.partialorder %v165_v16, 8.507059e+37 }
 0x286   :  { %v295_v11 = vpop.eup %294 }
 0x287   :  { %v157_v12 = vmul.f32 %v295_v11, %v155_v10  ;;  %vm162_vm5 = vweird.f32 %v295_v11 }
 0x288   :  { %vm163_vm7 = vmor %vm161_vm6, %vm162_vm5 }
 0x289   :  { %v158_v13 = vsub.f32 1.0, %v157_v12 }
 0x28b   :  { %v159_v15 = vmul.f32 %v295_v11, %v158_v13 }
 0x28d   :  { %v160_v17 = vadd.f32 %v295_v11, %v159_v15 }
 0x28f   :  { %v164_v19 = vsel %vm163_vm7, %v295_v11, %v160_v17 }
 0x290   :  { %v169_v20 = vsel %vm166_vm8, %v168_v18, %v164_v19 }
 0x291   :  { %v172_v21 = vperm.slane %v169_v20, 1  ;;  %v171_v22 = vperm.slane %v169_v20, 0 }
 0x293   :  { %v176_v23 = vmul.f32 %v293_v3, %v172_v21  ;;  %v175_v24 = vmul.f32 %v291_v2, %v171_v22 }
 0x295   :  { %207 = vperm.xlu0 %289, %v176_v23   ;;  %179 = vperm.xlu1 %287, %v175_v24  }
 0x307   :  { %v208_v25 = vpop.permute.xlu0 %207  ;;  %v180_v26 = vpop.permute.xlu1 %179 }
 0x308   :  { %v209_v27 = vperm.slane %v208_v25, %v120_v52  ;;  %v181_v28 = vperm.slane %v180_v26, %v120_v52 }
 0x30a   :  { %276 = vmatmul.msk.f32.vlgmr.msra.gmra.mxu1 %vm182_vm9, %v181_v28  ;;  %277 = vmatmul.msk.f32.vlgmr.msra.gmra.mxu2 %vm182_vm9, %v209_v27  ;;  %v239_v29 = vsel %vm123_vm3, %v209_v27, %v181_v28 }
 0x30b   :  { %241 = vst.msk [vmem:[#allocation4] sm:$0x3] %vm126_vm4, %v239_v29 }
 0x30c   :  { %263 = dma.vmem_to_hbm [thread:$0]  %s259_s13, 32, %s261_s16, [#allocation5]  }
 0x387   :  { %v202_v32 = vpop.f32.mrf.mxu1 }
 0x38d   :  { %v229_v30 = vpop.f32.mrf.mxu2 }
 0x38e   :  { %v234_v31 = vrot.slane %v229_v30, 7 }
 0x390   :  { %v235_v33 = vsel %vm123_vm3, %v234_v31, %v202_v32 }
 0x391   :  { %238 = vst.msk [vmem:[#allocation2] sm:$0x3] %vm237_vm10, %v235_v33 }
 0x392   :  { %252 = dma.vmem_to_hbm [thread:$0]  %s248_s18, 32, %s250_s21, [#allocation3]  }
 0x393   :  { %344 = dma.done.wait [#allocation3], 32  }
 0x394   :  { %345 = vsyncadd [#allocation3], 4294967264 }
 0x395   :  { %346 = dma.done.wait [#allocation5], 32  }
 0x396   :  { %347 = vsyncadd [#allocation5], 4294967264 }
 0x397   :  { %272 = vsyncpa [#allocation3], 1 }
 0x398   :  { %273 = vsyncpa [#allocation5], 1 }

</bundles_post_ra>
